<compile_context>
chip_gen: v5e
topology: v5e:2x2
jax: 0.10.0
libtpu: 0.0.40
codegen_flags: <defaults>
</compile_context>

<pallas_src>
import jax
import jax.numpy as jnp
from jax import lax
from jax.experimental import pallas as pl
from jax.experimental.pallas import tpu as pltpu


# ---------------------------------------------------------------------------
# Wrapper-side weight / shift-matrix transforms (trace-time constants).
# ---------------------------------------------------------------------------
def _band_weights_3x3(wt, W_img):
    """(3,3,Cin,Cout) -> (3, W_img*Cin, W_img*Cout) per-kh banded weights.

    band[kh, w'*Cin+ci, w*Cout+co] = wt[kh, w'-w+1, ci, co] when 0 <= w'-w+1 < 3
    else 0.  The W-boundary zeros of a 'same' conv are baked in (taps falling
    outside [0, W) simply have no row), so the kernel never materializes padded
    columns.  With X[m, w'*Cin+ci] = x[m, w', ci], one kh tap of the conv is a
    single matmul X_shifted @ band[kh] with a lane-dense (M, W*Cout) result.
    """
    _, _, cin, cout = wt.shape
    wp = jnp.arange(W_img)
    w = jnp.arange(W_img)
    kw = jnp.arange(3)
    mask = ((wp[None, :, None] - w[None, None, :] + 1)
            == kw[:, None, None]).astype(wt.dtype)                # (3, W, W)
    band = jnp.einsum("kpw,hkio->hpiwo", mask, wt)                # (3,W,Cin,W,Cout)
    return band.reshape(3, W_img * cin, W_img * cout)


def _pointwise_band_weight(ws, W_img):
    """(Cin,Cout) 1x1 conv -> (W_img*Cin, W_img*Cout) block-diagonal weight."""
    cin, cout = ws.shape
    eye = jnp.eye(W_img, dtype=ws.dtype)
    blk = jnp.einsum("pw,io->piwo", eye, ws)
    return blk.reshape(W_img * cin, W_img * cout)


def _row_shift_matrices(nb_imgs, H_img, dtype=jnp.float32):
    """Block-diagonal (per image) +/-1 row-shift matrices for the stacked
    (nb_imgs*H, :) activation layout.  su @ x puts x[m-1] in row m (zero at
    each image's first row); sd @ x puts x[m+1] in row m (zero at each image's
    last row).  Applied on the idle MXU: no XLU shuffles, no padded scratches,
    no misaligned sublane slices, and image boundaries stay exact."""
    mb = nb_imgs * H_img
    idx = jnp.arange(mb)
    same_img = (idx[:, None] // H_img) == (idx[None, :] // H_img)
    su = ((idx[None, :] == idx[:, None] - 1) & same_img).astype(dtype)
    sd = ((idx[None, :] == idx[:, None] + 1) & same_img).astype(dtype)
    return su, sd


# ---------------------------------------------------------------------------
# Fused residual-block kernel.
# ---------------------------------------------------------------------------
def residual_block(x_nhwc, params, *, grid_steps=1):
    """x_nhwc: (N, H, W, Cin) float32. Returns (N, H, W, Cout*expansion).

    grid_steps=1 folds the whole batch into one matmul M dimension (best on
    single-TC v5e/v6e).  On v7x set grid_steps=2 so the "parallel" batch-chunk
    axis keeps both TensorCores busy while each still gets a stacked M.
    """
    (w1, s1, b1, w2, s2, b2, ws, ss, bs) = params
    N, H, W, Cin = x_nhwc.shape
    C1 = w1.shape[-1]
    C2 = w2.shape[-1]
    assert N % grid_steps == 0
    NB = N // grid_steps            # images per grid step
    MB = NB * H                     # matmul M per grid step
    WCin, WC1, WC2 = W * Cin, W * C1, W * C2

    # Banded conv weights (W-boundary zeros baked in), shortcut, row shifts.
    w1b = _band_weights_3x3(w1, W)              # (3, WCin, WC1)
    w2b = _band_weights_3x3(w2, W)              # (3, WC1,  WC2)
    wsb = _pointwise_band_weight(ws, W)         # (WCin, WC2)
    su, sd = _row_shift_matrices(NB, H)         # (MB, MB) each

    # Folded-BN (eval) scale/bias tiled to the (W*C) lane layout.
    s1t = jnp.tile(s1, W).reshape(1, WC1)
    b1t = jnp.tile(b1, W).reshape(1, WC1)
    s2t = jnp.tile(s2, W).reshape(1, WC2)
    b2t = jnp.tile(b2, W).reshape(1, WC2)
    sst = jnp.tile(ss, W).reshape(1, WC2)
    bst = jnp.tile(bs, W).reshape(1, WC2)

    # Lane-dense activation layout (free reshape: trailing dims contiguous).
    x2d = x_nhwc.reshape(N * H, WCin)

    def kernel(x_ref, su_ref, sd_ref, w1_ref, ws_ref, s1_ref, b1_ref,
               w2_ref, s2_ref, b2_ref, ss_ref, bs_ref, out_ref):
        f32 = jnp.float32
        x = x_ref[...]                                           # (MB, WCin)
        su_m = su_ref[...]
        sd_m = sd_ref[...]

        # +/-1 row shifts of x (H-direction conv halo) via block-diag matmuls.
        xu = jnp.dot(su_m, x, preferred_element_type=f32)        # x[m-1]
        xd = jnp.dot(sd_m, x, preferred_element_type=f32)        # x[m+1]

        # conv1 (3x3, pad=1): three accumulating banded matmuls, one per kh.
        acc1 = jnp.dot(x, w1_ref[1], preferred_element_type=f32)
        acc1 = acc1 + jnp.dot(xu, w1_ref[0], preferred_element_type=f32)
        acc1 = acc1 + jnp.dot(xd, w1_ref[2], preferred_element_type=f32)
        y1 = jnp.maximum(acc1 * s1_ref[...] + b1_ref[...], 0.0)  # BN1 + ReLU

        # Shortcut: 1x1 conv + BN.
        sc = jnp.dot(x, ws_ref[...], preferred_element_type=f32)
        sc = sc * ss_ref[...] + bs_ref[...]

        # conv2 (3x3, pad=1): same structure on y1.
        y1u = jnp.dot(su_m, y1, preferred_element_type=f32)
        y1d = jnp.dot(sd_m, y1, preferred_element_type=f32)
        acc2 = jnp.dot(y1, w2_ref[1], preferred_element_type=f32)
        acc2 = acc2 + jnp.dot(y1u, w2_ref[0], preferred_element_type=f32)
        acc2 = acc2 + jnp.dot(y1d, w2_ref[2], preferred_element_type=f32)
        y2 = acc2 * s2_ref[...] + b2_ref[...]                     # BN2

        # Residual add, Dropout2d(0.1) in eval mode == identity, final ReLU.
        # TODO(synk): training-mode Dropout2d (per-channel Bernoulli mask +
        #             1/(1-p) scale) is not implemented; eval semantics only.
        out_ref[...] = jnp.maximum(y2 + sc, 0.0).astype(out_ref.dtype)

    # Advisory cost estimate so XLA schedules sensibly around the custom call.
    flops = grid_steps * (
        4 * MB * MB * (WCin + WC1)        # row-shift matmuls
        + 6 * MB * WCin * WC1             # conv1 (3 taps)
        + 2 * MB * WCin * WC2             # shortcut 1x1
        + 6 * MB * WC1 * WC2              # conv2 (3 taps)
        + 8 * MB * WC2                    # BN / ReLU / residual add
    )
    bytes_accessed = 4 * (
        grid_steps * (MB * WCin + MB * WC2)                       # acts in/out
        + 2 * MB * MB + 3 * WCin * WC1 + WCin * WC2
        + 3 * WC1 * WC2 + 2 * WC1 + 4 * WC2                       # weights
    )

    out2d = pl.pallas_call(
        kernel,
        out_shape=jax.ShapeDtypeStruct((N * H, WC2), x_nhwc.dtype),
        grid=(grid_steps,),
        in_specs=[
            pl.BlockSpec((MB, WCin), lambda g: (g, 0)),
            pl.BlockSpec((MB, MB), lambda g: (0, 0)),
            pl.BlockSpec((MB, MB), lambda g: (0, 0)),
            pl.BlockSpec((3, WCin, WC1), lambda g: (0, 0, 0)),
            pl.BlockSpec((WCin, WC2), lambda g: (0, 0)),
            pl.BlockSpec((1, WC1), lambda g: (0, 0)),
            pl.BlockSpec((1, WC1), lambda g: (0, 0)),
            pl.BlockSpec((3, WC1, WC2), lambda g: (0, 0, 0)),
            pl.BlockSpec((1, WC2), lambda g: (0, 0)),
            pl.BlockSpec((1, WC2), lambda g: (0, 0)),
            pl.BlockSpec((1, WC2), lambda g: (0, 0)),
            pl.BlockSpec((1, WC2), lambda g: (0, 0)),
        ],
        out_specs=pl.BlockSpec((MB, WC2), lambda g: (g, 0)),
        compiler_params=pltpu.CompilerParams(
            dimension_semantics=("parallel",),
            # Generous headroom; actual use is < 1 MiB at these shapes.  Note:
            # the banded weights grow O(W^2 * C^2) — at production ResNet sizes
            # switch to a W-tiled / im2col (K = 9*Cin) variant before they
            # approach v7x's 64 MiB VMEM.
            vmem_limit_bytes=48 * 1024 * 1024,
        ),
        cost_estimate=pl.CostEstimate(
            flops=flops, transcendentals=0, bytes_accessed=bytes_accessed),
    )(x2d, su, sd, w1b, wsb, s1t, b1t, w2b, s2t, b2t, sst, bst)

    return out2d.reshape(N, H, W, C2)


# ---------------------------------------------------------------------------
# Synthetic parameters + pure-JAX reference.
# ---------------------------------------------------------------------------
def make_params(key, in_channels, out_channels, expansion):
    """Deterministic synthetic parameters; BN (eval) folded to scale/bias (C,)."""
    c1 = out_channels
    c2 = out_channels * expansion
    ks = jax.random.split(key, 6)

    def bn_fold(k, c):
        kg, kb, km, kv = jax.random.split(k, 4)
        gamma = 1.0 + 0.1 * jax.random.normal(kg, (c,), jnp.float32)
        beta = 0.1 * jax.random.normal(kb, (c,), jnp.float32)
        mean = 0.1 * jax.random.normal(km, (c,), jnp.float32)
        var = 0.5 + 0.1 * jnp.abs(jax.random.normal(kv, (c,), jnp.float32))
        scale = gamma / jnp.sqrt(var + 1e-5)
        bias = beta - mean * scale
        return scale, bias

    w1 = 0.1 * jax.random.normal(ks[0], (3, 3, in_channels, c1), jnp.float32)
    s1, b1 = bn_fold(ks[1], c1)
    w2 = 0.1 * jax.random.normal(ks[2], (3, 3, c1, c2), jnp.float32)
    s2, b2 = bn_fold(ks[3], c2)
    ws = 0.1 * jax.random.normal(ks[4], (in_channels, c2), jnp.float32)
    ss, bs = bn_fold(ks[5], c2)
    return (w1, s1, b1, w2, s2, b2, ws, ss, bs)


def reference(x_nhwc, params):
    """Pure-JAX reference (eval-mode PyTorch semantics, NHWC)."""
    (w1, s1, b1, w2, s2, b2, ws, ss, bs) = params
    dn = ("NHWC", "HWIO", "NHWC")
    hp = lax.Precision.HIGHEST
    y = lax.conv_general_dilated(x_nhwc, w1, (1, 1), ((1, 1), (1, 1)),
                                 dimension_numbers=dn, precision=hp)
    y = jnp.maximum(y * s1 + b1, 0.0)
    y = lax.conv_general_dilated(y, w2, (1, 1), ((1, 1), (1, 1)),
                                 dimension_numbers=dn, precision=hp)
    y = y * s2 + b2
    sc = lax.conv_general_dilated(x_nhwc, ws.reshape(1, 1, *ws.shape),
                                  (1, 1), ((0, 0), (0, 0)),
                                  dimension_numbers=dn, precision=hp)
    sc = sc * ss + bs
    return jnp.maximum(y + sc, 0.0)


if __name__ == "__main__":
    # ResidualBlock(in_channels=4, out_channels=8, expansion=1, stride=1)
    # -> shortcut branch active (4 != 8).
    N, Cin, H, W = 2, 4, 16, 16
    Cout, expansion = 8, 1

    key = jax.random.PRNGKey(0)
    kx, kp = jax.random.split(key)
    x_nchw = jax.random.normal(kx, (N, Cin, H, W), jnp.float32)   # PyTorch layout
    x_nhwc = jnp.transpose(x_nchw, (0, 2, 3, 1))                  # kernel layout

    params = make_params(kp, Cin, Cout, expansion)

    out = jax.block_until_ready(residual_block(x_nhwc, params))
    ref = jax.block_until_ready(reference(x_nhwc, params))

    assert out.shape == (N, H, W, Cout * expansion)
    err = jnp.max(jnp.abs(out - ref))
    assert jnp.allclose(out, ref, rtol=1e-3, atol=1e-3), f"max abs err {err}"

    print("KERNEL_OK")
</pallas_src>

<mosaic_0001>
module attributes {stable_mosaic.version = 11 : i64} {
  func.func @kernel(%arg0: i32, %arg1: memref<32x64xf32, #tpu.memory_space<vmem>>, %arg2: memref<32x32xf32, #tpu.memory_space<vmem>>, %arg3: memref<32x32xf32, #tpu.memory_space<vmem>>, %arg4: memref<3x64x128xf32, #tpu.memory_space<vmem>>, %arg5: memref<64x128xf32, #tpu.memory_space<vmem>>, %arg6: memref<1x128xf32, #tpu.memory_space<vmem>>, %arg7: memref<1x128xf32, #tpu.memory_space<vmem>>, %arg8: memref<3x128x128xf32, #tpu.memory_space<vmem>>, %arg9: memref<1x128xf32, #tpu.memory_space<vmem>>, %arg10: memref<1x128xf32, #tpu.memory_space<vmem>>, %arg11: memref<1x128xf32, #tpu.memory_space<vmem>>, %arg12: memref<1x128xf32, #tpu.memory_space<vmem>>, %arg13: memref<32x128xf32, #tpu.memory_space<vmem>>) attributes {dimension_semantics = [#tpu.dimension_semantics<parallel>], iteration_bounds = array<i64: 1>, scalar_prefetch = 0 : i64, scratch_operands = 0 : i64, tpu.core_type = #tpu.core_type<tc>, window_params = [{transform_indices = @transform_0, window_bounds = array<i64: 32, 64>}, {pipeline_mode = #tpu.pipeline_mode<synchronous>, transform_indices = @transform_1, window_bounds = array<i64: 32, 32>}, {pipeline_mode = #tpu.pipeline_mode<synchronous>, transform_indices = @transform_2, window_bounds = array<i64: 32, 32>}, {pipeline_mode = #tpu.pipeline_mode<synchronous>, transform_indices = @transform_3, window_bounds = array<i64: 3, 64, 128>}, {pipeline_mode = #tpu.pipeline_mode<synchronous>, transform_indices = @transform_4, window_bounds = array<i64: 64, 128>}, {pipeline_mode = #tpu.pipeline_mode<synchronous>, transform_indices = @transform_5, window_bounds = array<i64: 1, 128>}, {pipeline_mode = #tpu.pipeline_mode<synchronous>, transform_indices = @transform_6, window_bounds = array<i64: 1, 128>}, {pipeline_mode = #tpu.pipeline_mode<synchronous>, transform_indices = @transform_7, window_bounds = array<i64: 3, 128, 128>}, {pipeline_mode = #tpu.pipeline_mode<synchronous>, transform_indices = @transform_8, window_bounds = array<i64: 1, 128>}, {pipeline_mode = #tpu.pipeline_mode<synchronous>, transform_indices = @transform_9, window_bounds = array<i64: 1, 128>}, {pipeline_mode = #tpu.pipeline_mode<synchronous>, transform_indices = @transform_10, window_bounds = array<i64: 1, 128>}, {pipeline_mode = #tpu.pipeline_mode<synchronous>, transform_indices = @transform_11, window_bounds = array<i64: 1, 128>}, {transform_indices = @transform_12, window_bounds = array<i64: 32, 128>}]} {
    %c0 = arith.constant 0 : index
    %c0_0 = arith.constant 0 : index
    %0 = vector.load %arg1[%c0, %c0_0] : memref<32x64xf32, #tpu.memory_space<vmem>>, vector<32x64xf32>
    %c0_1 = arith.constant 0 : index
    %c0_2 = arith.constant 0 : index
    %1 = vector.load %arg2[%c0_1, %c0_2] : memref<32x32xf32, #tpu.memory_space<vmem>>, vector<32x32xf32>
    %c0_3 = arith.constant 0 : index
    %c0_4 = arith.constant 0 : index
    %2 = vector.load %arg3[%c0_3, %c0_4] : memref<32x32xf32, #tpu.memory_space<vmem>>, vector<32x32xf32>
    %cst = arith.constant dense<0.000000e+00> : vector<32x64xf32>
    %3 = tpu.matmul %1, %0, %cst {dimension_numbers = #tpu.dot_dimension_numbers<[1], [0], [0], [1], [0, 0, 1, 1], [], []>} : vector<32x32xf32>, vector<32x64xf32>, vector<32x64xf32> -> vector<32x64xf32>
    %cst_5 = arith.constant dense<0.000000e+00> : vector<32x64xf32>
    %4 = tpu.matmul %2, %0, %cst_5 {dimension_numbers = #tpu.dot_dimension_numbers<[1], [0], [0], [1], [0, 0, 1, 1], [], []>} : vector<32x32xf32>, vector<32x64xf32>, vector<32x64xf32> -> vector<32x64xf32>
    %c1 = arith.constant 1 : index
    %c0_6 = arith.constant 0 : index
    %c0_7 = arith.constant 0 : index
    %5 = vector.load %arg4[%c1, %c0_6, %c0_7] : memref<3x64x128xf32, #tpu.memory_space<vmem>>, vector<1x64x128xf32>
    %6 = vector.shape_cast %5 : vector<1x64x128xf32> to vector<64x128xf32>
    %cst_8 = arith.constant dense<0.000000e+00> : vector<32x128xf32>
    %7 = tpu.matmul %0, %6, %cst_8 {dimension_numbers = #tpu.dot_dimension_numbers<[1], [0], [0], [1], [0, 0, 1, 1], [], []>} : vector<32x64xf32>, vector<64x128xf32>, vector<32x128xf32> -> vector<32x128xf32>
    %c0_9 = arith.constant 0 : index
    %c0_10 = arith.constant 0 : index
    %c0_11 = arith.constant 0 : index
    %8 = vector.load %arg4[%c0_9, %c0_10, %c0_11] : memref<3x64x128xf32, #tpu.memory_space<vmem>>, vector<1x64x128xf32>
    %9 = vector.shape_cast %8 : vector<1x64x128xf32> to vector<64x128xf32>
    %cst_12 = arith.constant dense<0.000000e+00> : vector<32x128xf32>
    %10 = tpu.matmul %3, %9, %cst_12 {dimension_numbers = #tpu.dot_dimension_numbers<[1], [0], [0], [1], [0, 0, 1, 1], [], []>} : vector<32x64xf32>, vector<64x128xf32>, vector<32x128xf32> -> vector<32x128xf32>
    %11 = arith.addf %7, %10 : vector<32x128xf32>
    %c2 = arith.constant 2 : index
    %c0_13 = arith.constant 0 : index
    %c0_14 = arith.constant 0 : index
    %12 = vector.load %arg4[%c2, %c0_13, %c0_14] : memref<3x64x128xf32, #tpu.memory_space<vmem>>, vector<1x64x128xf32>
    %13 = vector.shape_cast %12 : vector<1x64x128xf32> to vector<64x128xf32>
    %cst_15 = arith.constant dense<0.000000e+00> : vector<32x128xf32>
    %14 = tpu.matmul %4, %13, %cst_15 {dimension_numbers = #tpu.dot_dimension_numbers<[1], [0], [0], [1], [0, 0, 1, 1], [], []>} : vector<32x64xf32>, vector<64x128xf32>, vector<32x128xf32> -> vector<32x128xf32>
    %15 = arith.addf %11, %14 : vector<32x128xf32>
    %c0_16 = arith.constant 0 : index
    %c0_17 = arith.constant 0 : index
    %16 = vector.load %arg6[%c0_16, %c0_17] : memref<1x128xf32, #tpu.memory_space<vmem>>, vector<1x128xf32>
    %17 = vector.broadcast %16 : vector<1x128xf32> to vector<32x128xf32>
    %18 = arith.mulf %15, %17 : vector<32x128xf32>
    %c0_18 = arith.constant 0 : index
    %c0_19 = arith.constant 0 : index
    %19 = vector.load %arg7[%c0_18, %c0_19] : memref<1x128xf32, #tpu.memory_space<vmem>>, vector<1x128xf32>
    %20 = vector.broadcast %19 : vector<1x128xf32> to vector<32x128xf32>
    %21 = arith.addf %18, %20 : vector<32x128xf32>
    %cst_20 = arith.constant 0.000000e+00 : f32
    %22 = vector.broadcast %cst_20 : f32 to vector<32x128xf32>
    %23 = arith.maximumf %21, %22 : vector<32x128xf32>
    %c0_21 = arith.constant 0 : index
    %c0_22 = arith.constant 0 : index
    %24 = vector.load %arg5[%c0_21, %c0_22] : memref<64x128xf32, #tpu.memory_space<vmem>>, vector<64x128xf32>
    %cst_23 = arith.constant dense<0.000000e+00> : vector<32x128xf32>
    %25 = tpu.matmul %0, %24, %cst_23 {dimension_numbers = #tpu.dot_dimension_numbers<[1], [0], [0], [1], [0, 0, 1, 1], [], []>} : vector<32x64xf32>, vector<64x128xf32>, vector<32x128xf32> -> vector<32x128xf32>
    %c0_24 = arith.constant 0 : index
    %c0_25 = arith.constant 0 : index
    %26 = vector.load %arg11[%c0_24, %c0_25] : memref<1x128xf32, #tpu.memory_space<vmem>>, vector<1x128xf32>
    %27 = vector.broadcast %26 : vector<1x128xf32> to vector<32x128xf32>
    %28 = arith.mulf %25, %27 : vector<32x128xf32>
    %c0_26 = arith.constant 0 : index
    %c0_27 = arith.constant 0 : index
    %29 = vector.load %arg12[%c0_26, %c0_27] : memref<1x128xf32, #tpu.memory_space<vmem>>, vector<1x128xf32>
    %30 = vector.broadcast %29 : vector<1x128xf32> to vector<32x128xf32>
    %31 = arith.addf %28, %30 : vector<32x128xf32>
    %cst_28 = arith.constant dense<0.000000e+00> : vector<32x128xf32>
    %32 = tpu.matmul %1, %23, %cst_28 {dimension_numbers = #tpu.dot_dimension_numbers<[1], [0], [0], [1], [0, 0, 1, 1], [], []>} : vector<32x32xf32>, vector<32x128xf32>, vector<32x128xf32> -> vector<32x128xf32>
    %cst_29 = arith.constant dense<0.000000e+00> : vector<32x128xf32>
    %33 = tpu.matmul %2, %23, %cst_29 {dimension_numbers = #tpu.dot_dimension_numbers<[1], [0], [0], [1], [0, 0, 1, 1], [], []>} : vector<32x32xf32>, vector<32x128xf32>, vector<32x128xf32> -> vector<32x128xf32>
    %c1_30 = arith.constant 1 : index
    %c0_31 = arith.constant 0 : index
    %c0_32 = arith.constant 0 : index
    %34 = vector.load %arg8[%c1_30, %c0_31, %c0_32] : memref<3x128x128xf32, #tpu.memory_space<vmem>>, vector<1x128x128xf32>
    %35 = vector.shape_cast %34 : vector<1x128x128xf32> to vector<128x128xf32>
    %cst_33 = arith.constant dense<0.000000e+00> : vector<32x128xf32>
    %36 = tpu.matmul %23, %35, %cst_33 {dimension_numbers = #tpu.dot_dimension_numbers<[1], [0], [0], [1], [0, 0, 1, 1], [], []>} : vector<32x128xf32>, vector<128x128xf32>, vector<32x128xf32> -> vector<32x128xf32>
    %c0_34 = arith.constant 0 : index
    %c0_35 = arith.constant 0 : index
    %c0_36 = arith.constant 0 : index
    %37 = vector.load %arg8[%c0_34, %c0_35, %c0_36] : memref<3x128x128xf32, #tpu.memory_space<vmem>>, vector<1x128x128xf32>
    %38 = vector.shape_cast %37 : vector<1x128x128xf32> to vector<128x128xf32>
    %cst_37 = arith.constant dense<0.000000e+00> : vector<32x128xf32>
    %39 = tpu.matmul %32, %38, %cst_37 {dimension_numbers = #tpu.dot_dimension_numbers<[1], [0], [0], [1], [0, 0, 1, 1], [], []>} : vector<32x128xf32>, vector<128x128xf32>, vector<32x128xf32> -> vector<32x128xf32>
    %40 = arith.addf %36, %39 : vector<32x128xf32>
    %c2_38 = arith.constant 2 : index
    %c0_39 = arith.constant 0 : index
    %c0_40 = arith.constant 0 : index
    %41 = vector.load %arg8[%c2_38, %c0_39, %c0_40] : memref<3x128x128xf32, #tpu.memory_space<vmem>>, vector<1x128x128xf32>
    %42 = vector.shape_cast %41 : vector<1x128x128xf32> to vector<128x128xf32>
    %cst_41 = arith.constant dense<0.000000e+00> : vector<32x128xf32>
    %43 = tpu.matmul %33, %42, %cst_41 {dimension_numbers = #tpu.dot_dimension_numbers<[1], [0], [0], [1], [0, 0, 1, 1], [], []>} : vector<32x128xf32>, vector<128x128xf32>, vector<32x128xf32> -> vector<32x128xf32>
    %44 = arith.addf %40, %43 : vector<32x128xf32>
    %c0_42 = arith.constant 0 : index
    %c0_43 = arith.constant 0 : index
    %45 = vector.load %arg9[%c0_42, %c0_43] : memref<1x128xf32, #tpu.memory_space<vmem>>, vector<1x128xf32>
    %46 = vector.broadcast %45 : vector<1x128xf32> to vector<32x128xf32>
    %47 = arith.mulf %44, %46 : vector<32x128xf32>
    %c0_44 = arith.constant 0 : index
    %c0_45 = arith.constant 0 : index
    %48 = vector.load %arg10[%c0_44, %c0_45] : memref<1x128xf32, #tpu.memory_space<vmem>>, vector<1x128xf32>
    %49 = vector.broadcast %48 : vector<1x128xf32> to vector<32x128xf32>
    %50 = arith.addf %47, %49 : vector<32x128xf32>
    %51 = arith.addf %50, %31 : vector<32x128xf32>
    %cst_46 = arith.constant 0.000000e+00 : f32
    %52 = vector.broadcast %cst_46 : f32 to vector<32x128xf32>
    %53 = arith.maximumf %51, %52 : vector<32x128xf32>
    %c0_47 = arith.constant 0 : index
    %c0_48 = arith.constant 0 : index
    %54 = vector.load %arg13[%c0_47, %c0_48] : memref<32x128xf32, #tpu.memory_space<vmem>>, vector<32x128xf32>
    tpu.vector_store %arg13[%c0_47, %c0_48], %53 {strides = array<i32>} : memref<32x128xf32, #tpu.memory_space<vmem>>, vector<32x128xf32>,
    return
  }
  func.func @transform_0(%arg0: i32) -> (i32, i32) {
    %c0_i32 = arith.constant 0 : i32
    %c0_i32_0 = arith.constant 0 : i32
    return %arg0, %c0_i32 : i32, i32
  }
  func.func @transform_1(%arg0: i32) -> (i32, i32) {
    %c0_i32 = arith.constant 0 : i32
    %c0_i32_0 = arith.constant 0 : i32
    %c0_i32_1 = arith.constant 0 : i32
    return %c0_i32, %c0_i32_0 : i32, i32
  }
  func.func @transform_2(%arg0: i32) -> (i32, i32) {
    %c0_i32 = arith.constant 0 : i32
    %c0_i32_0 = arith.constant 0 : i32
    %c0_i32_1 = arith.constant 0 : i32
    return %c0_i32, %c0_i32_0 : i32, i32
  }
  func.func @transform_3(%arg0: i32) -> (i32, i32, i32) {
    %c0_i32 = arith.constant 0 : i32
    %c0_i32_0 = arith.constant 0 : i32
    %c0_i32_1 = arith.constant 0 : i32
    %c0_i32_2 = arith.constant 0 : i32
    return %c0_i32, %c0_i32_0, %c0_i32_1 : i32, i32, i32
  }
  func.func @transform_4(%arg0: i32) -> (i32, i32) {
    %c0_i32 = arith.constant 0 : i32
    %c0_i32_0 = arith.constant 0 : i32
    %c0_i32_1 = arith.constant 0 : i32
    return %c0_i32, %c0_i32_0 : i32, i32
  }
  func.func @transform_5(%arg0: i32) -> (i32, i32) {
    %c0_i32 = arith.constant 0 : i32
    %c0_i32_0 = arith.constant 0 : i32
    %c0_i32_1 = arith.constant 0 : i32
    return %c0_i32, %c0_i32_0 : i32, i32
  }
  func.func @transform_6(%arg0: i32) -> (i32, i32) {
    %c0_i32 = arith.constant 0 : i32
    %c0_i32_0 = arith.constant 0 : i32
    %c0_i32_1 = arith.constant 0 : i32
    return %c0_i32, %c0_i32_0 : i32, i32
  }
  func.func @transform_7(%arg0: i32) -> (i32, i32, i32) {
    %c0_i32 = arith.constant 0 : i32
    %c0_i32_0 = arith.constant 0 : i32
    %c0_i32_1 = arith.constant 0 : i32
    %c0_i32_2 = arith.constant 0 : i32
    return %c0_i32, %c0_i32_0, %c0_i32_1 : i32, i32, i32
  }
  func.func @transform_8(%arg0: i32) -> (i32, i32) {
    %c0_i32 = arith.constant 0 : i32
    %c0_i32_0 = arith.constant 0 : i32
    %c0_i32_1 = arith.constant 0 : i32
    return %c0_i32, %c0_i32_0 : i32, i32
  }
  func.func @transform_9(%arg0: i32) -> (i32, i32) {
    %c0_i32 = arith.constant 0 : i32
    %c0_i32_0 = arith.constant 0 : i32
    %c0_i32_1 = arith.constant 0 : i32
    return %c0_i32, %c0_i32_0 : i32, i32
  }
  func.func @transform_10(%arg0: i32) -> (i32, i32) {
    %c0_i32 = arith.constant 0 : i32
    %c0_i32_0 = arith.constant 0 : i32
    %c0_i32_1 = arith.constant 0 : i32
    return %c0_i32, %c0_i32_0 : i32, i32
  }
  func.func @transform_11(%arg0: i32) -> (i32, i32) {
    %c0_i32 = arith.constant 0 : i32
    %c0_i32_0 = arith.constant 0 : i32
    %c0_i32_1 = arith.constant 0 : i32
    return %c0_i32, %c0_i32_0 : i32, i32
  }
  func.func @transform_12(%arg0: i32) -> (i32, i32) {
    %c0_i32 = arith.constant 0 : i32
    %c0_i32_0 = arith.constant 0 : i32
    return %arg0, %c0_i32 : i32, i32
  }
}

</mosaic_0001>

<bundles_post_ra>
// kernel: tpu_custom_call.1
= control target key start
LH: loop header
LB: loop body
LE: loop exit
PB: predicated region body
PF: predicated region fallthrough
CT: control target
= control target key end

     0   :  { %17 = vsyncpa [#allocation3], 0  ;;  %s1170_s0 = inlined_call_operand.hbm [shape: f32[32,64], index: 0, kind: input, shape index: {}]   ;;  %s1171_s1 = inlined_call_operand.hbm [shape: f32[32,32], index: 1, kind: input, shape index: {}]   ;;  %s1172_s2 = inlined_call_operand.hbm [shape: f32[32,32], index: 2, kind: input, shape index: {}]   ;;  %s1173_s3 = inlined_call_operand.hbm [shape: f32[3,64,128], index: 3, kind: input, shape index: {}]   ;;  %s1174_s4 = inlined_call_operand.hbm [shape: f32[64,128], index: 4, kind: input, shape index: {}]   ;;  %s1175_s5 = inlined_call_operand.vmem [shape: f32[1,128], index: 5, kind: input, shape index: {}]   ;;  %s1176_s6 = inlined_call_operand.vmem [shape: f32[1,128], index: 6, kind: input, shape index: {}]   ;;  %s1177_s7 = inlined_call_operand.hbm [shape: f32[3,128,128], index: 7, kind: input, shape index: {}]   ;;  %s1178_s8 = inlined_call_operand.vmem [shape: f32[1,128], index: 8, kind: input, shape index: {}]   ;;  %s1179_s9 = inlined_call_operand.vmem [shape: f32[1,128], index: 9, kind: input, shape index: {}]   ;;  %s1180_s10 = inlined_call_operand.vmem [shape: f32[1,128], index: 10, kind: input, shape index: {}]   ;;  %s1181_s11 = inlined_call_operand.vmem [shape: f32[1,128], index: 11, kind: input, shape index: {}]   ;;  %s1182_s12 = inlined_call_operand.hbm [shape: f32[32,128], index: 12, kind: output, shape index: {}]  }
   0x1   :  { %18 = vsyncpa [#allocation6], 0 }
   0x2   :  { %19 = vsyncpa [#allocation9], 0 }
   0x3   :  { %20 = vsyncpa [#allocation12], 0 }
   0x4   :  { %21 = vsyncpa [#allocation4], 0  ;;  %s39_s23 = sshll.u32 %s1171_s1, 4  ;;  %s944_s24 = smov [#allocation5]   ;;  %s40_s23 = int_to_ptr.hbm [resolvable:$true] %s39_s23 }
   0x5   :  { %s41_s25 = sshll.u32 %s944_s24, 4  ;;  %s65_s28 = sshll.u32 %s1173_s3, 4  ;;  %s42_s25 = int_to_ptr.vmem [resolvable:$true] %s41_s25  ;;  %s66_s28 = int_to_ptr.hbm [resolvable:$true] %s65_s28 }
   0x6   :  { %s945_s29 = smov 128   ;;  %s946_s30 = smov 8  }
   0x7   :  { %47 = dma.hbm_to_vmem [thread:$0]  %s40_s23, 512, %s42_s25, [#allocation6], %s945_s29, %s945_s29, %s946_s30  }
   0x8   :  { %s947_s13 = smov [#allocation8]   ;;  %s26_s1 = sshll.u32 %s1170_s0, 4  ;;  %s27_s1 = int_to_ptr.hbm [resolvable:$true] %s26_s1 }
   0x9   :  { %s67_s14 = sshll.u32 %s947_s13, 4  ;;  %s52_s18 = sshll.u32 %s1172_s2, 4  ;;  %s68_s14 = int_to_ptr.vmem [resolvable:$true] %s67_s14  ;;  %s53_s18 = int_to_ptr.hbm [resolvable:$true] %s52_s18 }
   0xa   :  { %73 = dma.hbm_to_vmem [thread:$0]  %s66_s28, 3072, %s68_s14, [#allocation9], %s945_s29, %s945_s29, %s946_s30  }
   0xb   :  { %s948_s19 = smov [#allocation2]   ;;  %s949_s21 = smov [#allocation7]  }
   0xc   :  { %s28_s20 = sshll.u32 %s948_s19, 4  ;;  %s54_s0 = sshll.u32 %s949_s21, 4  ;;  %s29_s20 = int_to_ptr.vmem [resolvable:$true] %s28_s20  ;;  %s55_s0 = int_to_ptr.vmem [resolvable:$true] %s54_s0 }
   0xd   :  { %34 = dma.hbm_to_vmem [thread:$0]  %s27_s1, 512, %s29_s20, [#allocation3], %s945_s29, %s945_s29, %s946_s30  }
   0xe   :  { %s78_s24 = sshll.u32 %s1174_s4, 4  ;;  %s95_s26 = sshll.u32 %s1177_s7, 4  ;;  %s79_s24 = int_to_ptr.hbm [resolvable:$true] %s78_s24  ;;  %s96_s26 = int_to_ptr.hbm [resolvable:$true] %s95_s26 }
   0xf   :  { %60 = dma.hbm_to_vmem [thread:$0]  %s53_s18, 512, %s55_s0, [#allocation6], %s945_s29, %s945_s29, %s946_s30  }
  0x10   :  { %s950_s27 = smov [#allocation10]   ;;  %s951_s13 = smov [#allocation11]  }
  0x11   :  { %s80_s28 = sshll.u32 %s950_s27, 4  ;;  %s97_s4 = sshll.u32 %s951_s13, 4  ;;  %s81_s28 = int_to_ptr.vmem [resolvable:$true] %s80_s28  ;;  %s98_s4 = int_to_ptr.vmem [resolvable:$true] %s97_s4 }
  0x12   :  { %86 = dma.hbm_to_vmem [thread:$0]  %s79_s24, 1024, %s81_s28, [#allocation9], %s945_s29, %s945_s29, %s946_s30  }
  0x13   :  { %103 = dma.hbm_to_vmem [thread:$0]  %s96_s26, 6144, %s98_s4, [#allocation12], %s945_s29, %s945_s29, %s946_s30  }
  0x14   :  { %934 = dma.done.wait [#allocation3], 512  }
  0x15   :  { %935 = vsyncadd [#allocation3], 4294966784 }
  0x16   :  { %936 = dma.done.wait [#allocation6], 1024  }
  0x17   :  { %937 = vsyncadd [#allocation6], 4294966272 }
  0x18   :  { %938 = dma.done.wait [#allocation9], 4096  }
  0x19   :  { %939 = vsyncadd [#allocation9], 4294963200 }
  0x1a   :  { %940 = dma.done.wait [#allocation12], 6144  }
  0x1b   :  { %941 = vsyncadd [#allocation12], 4294961152  ;;  %v1054_v0 = vld [vmem:[#allocation2 + $0x18] sm:$0xff]  ;;  %v1056_v1 = vld [vmem:[#allocation2 + $0x10] sm:$0xff]  ;;  %vm148_vm0 = vcmask 261120   ;;  %vm248_vm1 = vcmask 523264  }
  0x1c   :  { %173 = vmatpush.msra.mxu0 %v1054_v0  ;;  %739 = vmatpush.msra.mxu2 %v1054_v0  ;;  %v1060_v2 = vld [vmem:[#allocation2 + $0x8] sm:$0xff]  ;;  %v1065_v3 = vld [vmem:[#allocation2] sm:$0xff]  ;;  %v1072_v5 = vld [vmem:[#allocation5 + $0x10] sm:$0xff]  ;;  %s691_s21 = sshll.u32 %s1182_s12, 4  ;;  %s692_s21 = int_to_ptr.hbm [resolvable:$true] %s691_s21 }
  0x1d   :  { %214 = vmatpush.msra.mxu1 %v1054_v0  ;;  %v1069_v4 = vld [vmem:[#allocation5] sm:$0xff]  ;;  %v247_v6 = vld [vmem:[#allocation8 + $0x38] sm:$0xff]  ;;  %v246_v8 = vld [vmem:[#allocation8 + $0x30] sm:$0xff] }
  0x1e   :  { %174 = vmatpush.msra.mxu0 %v1056_v1  ;;  %740 = vmatpush.msra.mxu2 %v1056_v1  ;;  %v1075_v7 = vld [vmem:[#allocation7] sm:$0xff]  ;;  %v245_v9 = vld [vmem:[#allocation8 + $0x28] sm:$0xff]  ;;  %v1088_v12 = vld [vmem:[#allocation5 + $0x18] sm:$0xff] }
  0x1f   :  { %215 = vmatpush.msra.mxu1 %v1056_v1  ;;  %743 = vmatpush.msra.mxu3 %v247_v6  ;;  %v244_v10 = vld [vmem:[#allocation8 + $0x20] sm:$0xff]  ;;  %v1086_v11 = vld [vmem:[#allocation5 + $0x8] sm:$0xff]  ;;  %v243_v13 = vld [vmem:[#allocation8 + $0x18] sm:$0xff] }
  0x20   :  { %175 = vmatpush.msra.mxu0 %v1060_v2  ;;  %741 = vmatpush.msra.mxu2 %v1060_v2  ;;  %v1090_v14 = vld [vmem:[#allocation7 + $0x8] sm:$0xff]  ;;  %v242_v15 = vld [vmem:[#allocation8 + $0x10] sm:$0xff]  ;;  %v1102_v18 = vld [vmem:[#allocation7 + $0x18] sm:$0xff] }
  0x21   :  { %216 = vmatpush.msra.mxu1 %v1060_v2  ;;  %744 = vmatpush.msra.mxu3 %v246_v8  ;;  %v241_v16 = vld [vmem:[#allocation8 + $0x8] sm:$0xff]  ;;  %v1098_v17 = vld [vmem:[#allocation7 + $0x10] sm:$0xff]  ;;  %v240_v19 = vld [vmem:[#allocation8] sm:$0xff] }
  0x22   :  { %176 = vmatpush.msra.mxu0 %v1065_v3  ;;  %742 = vmatpush.msra.mxu2 %v1065_v3  ;;  %v239_v20 = vld [vmem:[#allocation8 + $0x78] sm:$0xff]  ;;  %v238_v21 = vld [vmem:[#allocation8 + $0x70] sm:$0xff]  ;;  %v237_v22 = vld [vmem:[#allocation8 + $0x68] sm:$0xff] }
  0x23   :  { %707 = vmatmul.msk.f32.vlgmr.msra.gmra.mxu0 %vm148_vm0, %v1069_v4  ;;  %709 = vmatmul.msk.f32.vlgmr.msra.gmra.mxu2 %vm148_vm0, %v1072_v5  ;;  %v236_v23 = vld [vmem:[#allocation8 + $0x60] sm:$0xff]  ;;  %v235_v24 = vld [vmem:[#allocation8 + $0x58] sm:$0xff]  ;;  %v234_v26 = vld [vmem:[#allocation8 + $0x50] sm:$0xff] }
  0x24   :  { %217 = vmatpush.msra.mxu1 %v1065_v3  ;;  %269 = vmatpush.msrb.mxu2 %v247_v6  ;;  %v339_v25 = vld [vmem:[#allocation8 + $0xb8] sm:$0xff]  ;;  %v338_v27 = vld [vmem:[#allocation8 + $0xb0] sm:$0xff]  ;;  %v233_v28 = vld [vmem:[#allocation8 + $0x48] sm:$0xff] }
  0x25   :  { %711 = vmatmul.msk.f32.vlgmr.msra.gmra.mxu1 %vm148_vm0, %v1075_v7  ;;  %745 = vmatpush.msra.mxu3 %v245_v9  ;;  %v337_v29 = vld [vmem:[#allocation8 + $0xa8] sm:$0xff]  ;;  %v232_v30 = vld [vmem:[#allocation8 + $0x40] sm:$0xff]  ;;  %v335_v33 = vld [vmem:[#allocation8 + $0x98] sm:$0xff] }
  0x26   :  { %270 = vmatpush.msrb.mxu2 %v246_v8  ;;  %360 = vmatpush.msrb.mxu0 %v339_v25  ;;  %v336_v31 = vld [vmem:[#allocation8 + $0xa0] sm:$0xff]  ;;  %v334_v34 = vld [vmem:[#allocation8 + $0x90] sm:$0xff]  ;;  %v333_v36 = vld [vmem:[#allocation8 + $0x88] sm:$0xff] }
  0x27   :  { %746 = vmatpush.msra.mxu3 %v244_v10  ;;  %v332_v37 = vld [vmem:[#allocation8 + $0x80] sm:$0xff]  ;;  %v412_v43 = vld [vmem:[#allocation10 + $0x38] sm:$0xff]  ;;  %v411_v44 = vld [vmem:[#allocation10 + $0x30] sm:$0xff] }
  0x28   :  { %271 = vmatpush.msrb.mxu2 %v245_v9  ;;  %361 = vmatpush.msrb.mxu0 %v338_v27  ;;  %v410_v46 = vld [vmem:[#allocation10 + $0x28] sm:$0xff]  ;;  %v409_v47 = vld [vmem:[#allocation10 + $0x20] sm:$0xff]  ;;  %v408_v48 = vld [vmem:[#allocation10 + $0x18] sm:$0xff] }
  0x29   :  { %747 = vmatpush.msra.mxu3 %v243_v13  ;;  %421 = vmatpush.msrb.mxu1 %v412_v43  ;;  %v407_v49 = vld [vmem:[#allocation10 + $0x10] sm:$0xff]  ;;  %v406_v50 = vld [vmem:[#allocation10 + $0x8] sm:$0xff]  ;;  %v405_v51 = vld [vmem:[#allocation10] sm:$0xff] }
  0x2a   :  { %272 = vmatpush.msrb.mxu2 %v244_v10  ;;  %362 = vmatpush.msrb.mxu0 %v337_v29  ;;  %v532_v52 = vld [vmem:[#allocation11 + $0xf8] sm:$0xff]  ;;  %v531_v53 = vld [vmem:[#allocation11 + $0xf0] sm:$0xff]  ;;  %v530_v54 = vld [vmem:[#allocation11 + $0xe8] sm:$0xff] }
  0x2b   :  { %708 = vmatmul.msk.f32.gmra.mxu0 %vm148_vm0, %v1086_v11  ;;  %710 = vmatmul.msk.f32.gmra.mxu2 %vm148_vm0, %v1088_v12  ;;  %v529_v55 = vld [vmem:[#allocation11 + $0xe0] sm:$0xff]  ;;  %v528_v56 = vld [vmem:[#allocation11 + $0xd8] sm:$0xff]  ;;  %v527_v57 = vld [vmem:[#allocation11 + $0xd0] sm:$0xff] }
  0x2c   :  { %273 = vmatpush.msrb.mxu2 %v243_v13  ;;  %748 = vmatpush.msra.mxu3 %v242_v15  ;;  %v526_v58 = vld [vmem:[#allocation11 + $0xc8] sm:$0xff]  ;;  %v525_v59 = vld [vmem:[#allocation11 + $0xc0] sm:$0xff]  ;;  %v524_v60 = vld [vmem:[#allocation11 + $0xb8] sm:$0xff] }
  0x2d   :  { %712 = vmatmul.msk.f32.gmra.mxu1 %vm148_vm0, %v1090_v14  ;;  %363 = vmatpush.msrb.mxu0 %v336_v31  ;;  %v523_v61 = vld [vmem:[#allocation11 + $0xb0] sm:$0xff]  ;;  %v522_v62 = vld [vmem:[#allocation11 + $0xa8] sm:$0xff]  ;;  %v521_v63 = vld [vmem:[#allocation11 + $0xa0] sm:$0xff] }
  0x2e   :  { %274 = vmatpush.msrb.mxu2 %v242_v15  ;;  %749 = vmatpush.msra.mxu3 %v241_v16  ;;  %v518_v6 = vld [vmem:[#allocation11 + $0x88] sm:$0xff]  ;;  %v517_v9 = vld [vmem:[#allocation11 + $0x80] sm:$0xff] }
  0x2f   :  { %364 = vmatpush.msrb.mxu0 %v335_v33  ;;  %422 = vmatpush.msrb.mxu1 %v411_v44 }
  0x30   :  { %275 = vmatpush.msrb.mxu2 %v241_v16  ;;  %750 = vmatpush.msra.mxu3 %v240_v19 }
  0x31   :  { %365 = vmatpush.msrb.mxu0 %v334_v34  ;;  %423 = vmatpush.msrb.mxu1 %v410_v46  ;;  %v622_v46 = vld [vmem:[#allocation11 + $0x170] sm:$0xff] }
  0x32   :  { %276 = vmatpush.msrb.mxu2 %v240_v19  ;;  %310 = vmatpush.msrb.mxu3 %v239_v20  ;;  %v760_v20 = vld [vmem:[%s1175_s5] ss:$0 sm:$0xff] }
  0x33   :  { %366 = vmatpush.msrb.mxu0 %v333_v36  ;;  %424 = vmatpush.msrb.mxu1 %v409_v47  ;;  %v546_v47 = vld [vmem:[#allocation11 + $0x68] sm:$0xff] }
  0x34   :  { %311 = vmatpush.msrb.mxu3 %v238_v21  ;;  %v761_v21 = vld [vmem:[%s1176_s6] ss:$0 sm:$0xff] }
  0x35   :  { %713 = vmatmul.msk.f32.gmra.mxu1 %vm148_vm0, %v1098_v17  ;;  %367 = vmatpush.msrb.mxu0 %v332_v37 }
  0x36   :  { %312 = vmatpush.msrb.mxu3 %v237_v22  ;;  %425 = vmatpush.msrb.mxu1 %v408_v48  ;;  %v620_v48 = vld [vmem:[#allocation11 + $0x160] sm:$0xff] }
  0x38   :  { %313 = vmatpush.msrb.mxu3 %v236_v23  ;;  %426 = vmatpush.msrb.mxu1 %v407_v49  ;;  %v619_v49 = vld [vmem:[#allocation11 + $0x158] sm:$0xff] }
  0x3a   :  { %314 = vmatpush.msrb.mxu3 %v235_v24  ;;  %427 = vmatpush.msrb.mxu1 %v406_v50  ;;  %v542_v50 = vld [vmem:[#allocation11 + $0x48] sm:$0xff] }
  0x3c   :  { %315 = vmatpush.msrb.mxu3 %v234_v26  ;;  %428 = vmatpush.msrb.mxu1 %v405_v51  ;;  %v617_v51 = vld [vmem:[#allocation11 + $0x148] sm:$0xff] }
  0x3d   :  { %714 = vmatmul.msk.f32.gmra.mxu1 %vm148_vm0, %v1102_v18 }
  0x3e   :  { %316 = vmatpush.msrb.mxu3 %v233_v28  ;;  %578 = vmatpush.msra.mxu1 %v532_v52  ;;  %v541_v52 = vld [vmem:[#allocation11 + $0x40] sm:$0xff] }
  0x40   :  { %317 = vmatpush.msrb.mxu3 %v232_v30  ;;  %579 = vmatpush.msra.mxu1 %v531_v53  ;;  %v616_v53 = vld [vmem:[#allocation11 + $0x140] sm:$0xff] }
  0x42   :  { %580 = vmatpush.msra.mxu1 %v530_v54  ;;  %v540_v54 = vld [vmem:[#allocation11 + $0x38] sm:$0xff] }
  0x44   :  { %581 = vmatpush.msra.mxu1 %v529_v55  ;;  %v615_v55 = vld [vmem:[#allocation11 + $0x138] sm:$0xff] }
  0x45   :  { %727 = vmatmul.msk.f32.vlgmr.msrb.gmra.mxu1 %vm248_vm1, %v1065_v3 }
  0x46   :  { %582 = vmatpush.msra.mxu1 %v528_v56  ;;  %v539_v56 = vld [vmem:[#allocation11 + $0x30] sm:$0xff] }
  0x48   :  { %583 = vmatpush.msra.mxu1 %v527_v57  ;;  %v614_v57 = vld [vmem:[#allocation11 + $0x130] sm:$0xff] }
  0x4a   :  { %584 = vmatpush.msra.mxu1 %v526_v58  ;;  %v538_v58 = vld [vmem:[#allocation11 + $0x28] sm:$0xff] }
  0x4c   :  { %585 = vmatpush.msra.mxu1 %v525_v59  ;;  %v613_v59 = vld [vmem:[#allocation11 + $0x128] sm:$0xff] }
  0x4d   :  { %728 = vmatmul.msk.f32.gmra.mxu1 %vm248_vm1, %v1060_v2 }
  0x4e   :  { %586 = vmatpush.msra.mxu1 %v524_v60  ;;  %v537_v60 = vld [vmem:[#allocation11 + $0x20] sm:$0xff] }
  0x50   :  { %587 = vmatpush.msra.mxu1 %v523_v61  ;;  %v612_v61 = vld [vmem:[#allocation11 + $0x120] sm:$0xff] }
  0x52   :  { %588 = vmatpush.msra.mxu1 %v522_v62  ;;  %v536_v62 = vld [vmem:[#allocation11 + $0x18] sm:$0xff] }
  0x54   :  { %589 = vmatpush.msra.mxu1 %v521_v63  ;;  %v611_v63 = vld [vmem:[#allocation11 + $0x118] sm:$0xff] }
  0x55   :  { %729 = vmatmul.msk.f32.gmra.mxu1 %vm248_vm1, %v1056_v1 }
  0x5d   :  { %730 = vmatmul.msk.f32.gmra.mxu1 %vm248_vm1, %v1054_v0 }
  0xa0   :  { %v178_v32 = vpop.f32.mrf.mxu0 }
  0xa1   :  { %715 = vmatmul.msk.f32.vlgmr.msrb.gmra.mxu2 %vm248_vm1, %v178_v32 }
  0xa2   :  { %v219_v35 = vpop.f32.mrf.mxu1 }
  0xa3   :  { %723 = vmatmul.msk.f32.vlgmr.msrb.gmra.mxu0 %vm248_vm1, %v219_v35 }
  0xa6   :  { %v184_v40 = vpop.f32.mrf.mxu2 }
  0xa8   :  { %v181_v38 = vpop.f32.mrf.mxu0 }
  0xa9   :  { %716 = vmatmul.msk.f32.vlgmr.msra.gmra.mxu3 %vm248_vm1, %v181_v38 }
  0xaa   :  { %v222_v39 = vpop.f32.mrf.mxu1 }
  0xab   :  { %724 = vmatmul.msk.f32.gmra.mxu0 %vm248_vm1, %v222_v39 }
  0xae   :  { %v187_v42 = vpop.f32.mrf.mxu2 }
  0xb1   :  { %717 = vmatmul.msk.f32.gmra.mxu3 %vm248_vm1, %v184_v40 }
  0xb2   :  { %v225_v41 = vpop.f32.mrf.mxu1 }
  0xb3   :  { %725 = vmatmul.msk.f32.gmra.mxu0 %vm248_vm1, %v225_v41 }
  0xb9   :  { %718 = vmatmul.msk.f32.gmra.mxu3 %vm248_vm1, %v187_v42 }
  0xba   :  { %v228_v45 = vpop.f32.mrf.mxu1 }
  0xbb   :  { %726 = vmatmul.msk.f32.gmra.mxu0 %vm248_vm1, %v228_v45 }
  0xc1   :  { %719 = vmatmul.msk.f32.vlgmr.msrb.gmra.mxu3 %vm248_vm1, %v1065_v3  ;;  %v519_v3 = vld [vmem:[#allocation11 + $0x90] sm:$0xff] }
  0xc9   :  { %720 = vmatmul.msk.f32.gmra.mxu3 %vm248_vm1, %v1060_v2  ;;  %v520_v2 = vld [vmem:[#allocation11 + $0x98] sm:$0xff] }
  0xca   :  { %590 = vmatpush.msra.mxu1 %v520_v2  ;;  %v535_v2 = vld [vmem:[#allocation11 + $0x10] sm:$0xff] }
  0xcc   :  { %591 = vmatpush.msra.mxu1 %v519_v3  ;;  %v610_v3 = vld [vmem:[#allocation11 + $0x110] sm:$0xff] }
  0xce   :  { %592 = vmatpush.msra.mxu1 %v518_v6  ;;  %v534_v6 = vld [vmem:[#allocation11 + $0x8] sm:$0xff] }
  0xd0   :  { %593 = vmatpush.msra.mxu1 %v517_v9  ;;  %v533_v9 = vld [vmem:[#allocation11] sm:$0xff] }
  0xd1   :  { %721 = vmatmul.msk.f32.gmra.mxu3 %vm248_vm1, %v1056_v1 }
  0xd9   :  { %722 = vmatmul.msk.f32.gmra.mxu3 %vm248_vm1, %v1054_v0 }
 0x120   :  { %v369_v13 = vpop.f32.mrf.mxu0 }
 0x124   :  { %v278_v15 = vpop.f32.mrf.mxu2 }
 0x128   :  { %v372_v22 = vpop.f32.mrf.mxu0 }
 0x12c   :  { %v281_v8 = vpop.f32.mrf.mxu3 }
 0x130   :  { %v375_v30 = vpop.f32.mrf.mxu0 }
 0x134   :  { %v284_v1 = vpop.f32.mrf.mxu3 }
 0x138   :  { %v378_v39 = vpop.f32.mrf.mxu0 }
 0x13c   :  { %v287_v10 = vpop.f32.mrf.mxu3 }
 0x144   :  { %v319_v16 = vpop.f32.mrf.mxu3 }
 0x145   :  { %v320_v19 = vadd.f32 %v319_v16, %v278_v15 }
 0x147   :  { %v381_v0 = vadd.f32 %v369_v13, %v320_v19 }
 0x149   :  { %v389_v23 = vmul.f32 %v760_v20, %v381_v0 }
 0x14b   :  { %v397_v24 = vadd.f32 %v761_v21, %v389_v23 }
 0x14c   :  { %v322_v25 = vpop.f32.mrf.mxu3 }
 0x14d   :  { %v401_v26 = vmax.f32 %v397_v24, 0.0  ;;  %v323_v27 = vadd.f32 %v322_v25, %v281_v8  ;;  %v609_v8 = vld [vmem:[#allocation11 + $0x108] sm:$0xff] }
 0x14f   :  { %v382_v28 = vadd.f32 %v372_v22, %v323_v27  ;;  %594 = vmatmul.f32.vlgmr.msra.gmra.mxu1 %v401_v26  ;;  %v430_v22 = vpop.f32.mrf.mxu1 }
 0x151   :  { %v390_v29 = vmul.f32 %v760_v20, %v382_v28  ;;  %v762_v28 = vld [vmem:[%s1180_s10] ss:$0 sm:$0xff] }
 0x153   :  { %v398_v31 = vadd.f32 %v761_v21, %v390_v29 }
 0x154   :  { %v325_v32 = vpop.f32.mrf.mxu3 }
 0x155   :  { %v326_v33 = vadd.f32 %v325_v32, %v284_v1  ;;  %v402_v34 = vmax.f32 %v398_v31, 0.0  ;;  %v608_v1 = vld [vmem:[#allocation11 + $0x100] sm:$0xff]  ;;  %v446_v32 = vmul.f32 %v762_v28, %v430_v22 }
 0x157   :  { %v383_v35 = vadd.f32 %v375_v30, %v326_v33  ;;  %597 = vmatmul.f32.gmra.mxu1 %v402_v34  ;;  %v433_v23 = vpop.f32.mrf.mxu1  ;;  %v764_v30 = vld [vmem:[%s1178_s8] ss:$0 sm:$0xff]  ;;  %s952_s8 = smov [#allocation13]  }
 0x158   :  { %v763_v33 = vld [vmem:[%s1181_s11] ss:$0 sm:$0xff] }
 0x159   :  { %v391_v36 = vmul.f32 %v760_v20, %v383_v35  ;;  %v765_v35 = vld [vmem:[%s1179_s9] ss:$0 sm:$0xff]  ;;  %s689_s9 = sshll.u32 %s952_s8, 4  ;;  %s690_s9 = int_to_ptr.vmem [resolvable:$true] %s689_s9 }
 0x15b   :  { %v399_v37 = vadd.f32 %v761_v21, %v391_v36 }
 0x15c   :  { %v328_v38 = vpop.f32.mrf.mxu3 }
 0x15d   :  { %v329_v40 = vadd.f32 %v328_v38, %v287_v10  ;;  %v403_v41 = vmax.f32 %v399_v37, 0.0 }
 0x15f   :  { %v384_v42 = vadd.f32 %v378_v39, %v329_v40  ;;  %600 = vmatmul.f32.gmra.mxu1 %v403_v41  ;;  %v436_v24 = vpop.f32.mrf.mxu1  ;;  %v454_v39 = vadd.f32 %v763_v33, %v446_v32 }
 0x161   :  { %v392_v43 = vmul.f32 %v760_v20, %v384_v42 }
 0x163   :  { %v400_v44 = vadd.f32 %v761_v21, %v392_v43 }
 0x165   :  { %v404_v45 = vmax.f32 %v400_v44, 0.0  ;;  %v447_v44 = vmul.f32 %v762_v28, %v433_v23 }
 0x167   :  { %470 = vmatpush.msra.mxu2 %v404_v45  ;;  %499 = vmatpush.msra.mxu3 %v404_v45  ;;  %v439_v25 = vpop.f32.mrf.mxu1 }
 0x168   :  { %603 = vmatmul.f32.gmra.mxu1 %v404_v45 }
 0x169   :  { %471 = vmatpush.msra.mxu2 %v403_v41  ;;  %500 = vmatpush.msra.mxu3 %v403_v41 }
 0x16b   :  { %472 = vmatpush.msra.mxu2 %v402_v34  ;;  %501 = vmatpush.msra.mxu3 %v402_v34 }
 0x16d   :  { %473 = vmatpush.msra.mxu2 %v401_v26  ;;  %502 = vmatpush.msra.mxu3 %v401_v26 }
 0x16e   :  { %731 = vmatmul.msk.f32.vlgmr.msra.gmra.mxu2 %vm148_vm0, %v1069_v4  ;;  %735 = vmatmul.msk.f32.vlgmr.msra.gmra.mxu3 %vm148_vm0, %v1075_v7  ;;  %v548_v4 = vld [vmem:[#allocation11 + $0x78] sm:$0xff] }
 0x16f   :  { %v623_v7 = vld [vmem:[#allocation11 + $0x178] sm:$0xff]  ;;  %549 = vmatpush.msra.mxu0 %v548_v4 }
 0x170   :  { %624 = vmatpush.msrb.mxu2 %v623_v7 }
 0x172   :  { %625 = vmatpush.msrb.mxu2 %v622_v46 }
 0x176   :  { %732 = vmatmul.msk.f32.gmra.mxu2 %vm148_vm0, %v1086_v11  ;;  %736 = vmatmul.msk.f32.gmra.mxu3 %vm148_vm0, %v1090_v14  ;;  %v547_v11 = vld [vmem:[#allocation11 + $0x70] sm:$0xff]  ;;  %v621_v14 = vld [vmem:[#allocation11 + $0x168] sm:$0xff] }
 0x177   :  { %550 = vmatpush.msra.mxu0 %v547_v11  ;;  %626 = vmatpush.msrb.mxu2 %v621_v14 }
 0x179   :  { %551 = vmatpush.msra.mxu0 %v546_v47  ;;  %627 = vmatpush.msrb.mxu2 %v620_v48  ;;  %v455_v47 = vadd.f32 %v763_v33, %v447_v44 }
 0x17b   :  { %628 = vmatpush.msrb.mxu2 %v619_v49  ;;  %v448_v49 = vmul.f32 %v762_v28, %v436_v24 }
 0x17e   :  { %733 = vmatmul.msk.f32.gmra.mxu2 %vm148_vm0, %v1072_v5  ;;  %737 = vmatmul.msk.f32.gmra.mxu3 %vm148_vm0, %v1098_v17  ;;  %v545_v5 = vld [vmem:[#allocation11 + $0x60] sm:$0xff]  ;;  %v544_v17 = vld [vmem:[#allocation11 + $0x58] sm:$0xff] }
 0x17f   :  { %552 = vmatpush.msra.mxu0 %v545_v5 }
 0x181   :  { %553 = vmatpush.msra.mxu0 %v544_v17 }
 0x186   :  { %734 = vmatmul.msk.f32.gmra.mxu2 %vm148_vm0, %v1088_v12  ;;  %738 = vmatmul.msk.f32.gmra.mxu3 %vm148_vm0, %v1102_v18  ;;  %v543_v12 = vld [vmem:[#allocation11 + $0x50] sm:$0xff] }
 0x187   :  { %v618_v18 = vld [vmem:[#allocation11 + $0x150] sm:$0xff]  ;;  %554 = vmatpush.msra.mxu0 %v543_v12 }
 0x188   :  { %629 = vmatpush.msrb.mxu2 %v618_v18 }
 0x189   :  { %555 = vmatpush.msra.mxu0 %v542_v50 }
 0x18a   :  { %630 = vmatpush.msrb.mxu2 %v617_v51 }
 0x18b   :  { %556 = vmatpush.msra.mxu0 %v541_v52  ;;  %v456_v52 = vadd.f32 %v763_v33, %v448_v49 }
 0x18c   :  { %631 = vmatpush.msrb.mxu2 %v616_v53 }
 0x18d   :  { %557 = vmatpush.msra.mxu0 %v540_v54 }
 0x18e   :  { %632 = vmatpush.msrb.mxu2 %v615_v55 }
 0x18f   :  { %558 = vmatpush.msra.mxu0 %v539_v56 }
 0x190   :  { %633 = vmatpush.msrb.mxu2 %v614_v57 }
 0x191   :  { %559 = vmatpush.msra.mxu0 %v538_v58  ;;  %v449_v58 = vmul.f32 %v762_v28, %v439_v25 }
 0x192   :  { %634 = vmatpush.msrb.mxu2 %v613_v59 }
 0x193   :  { %560 = vmatpush.msra.mxu0 %v537_v60 }
 0x194   :  { %635 = vmatpush.msrb.mxu2 %v612_v61 }
 0x195   :  { %561 = vmatpush.msra.mxu0 %v536_v62  ;;  %v457_v62 = vadd.f32 %v763_v33, %v449_v58 }
 0x196   :  { %636 = vmatpush.msrb.mxu2 %v611_v63 }
 0x197   :  { %562 = vmatpush.msra.mxu0 %v535_v2 }
 0x198   :  { %637 = vmatpush.msrb.mxu2 %v610_v3 }
 0x199   :  { %563 = vmatpush.msra.mxu0 %v534_v6 }
 0x19a   :  { %638 = vmatpush.msrb.mxu2 %v609_v8 }
 0x19b   :  { %564 = vmatpush.msra.mxu0 %v533_v9 }
 0x19c   :  { %639 = vmatpush.msrb.mxu2 %v608_v1 }
 0x1cc   :  { %v595_v26 = vpop.f32.mrf.mxu1 }
 0x1d4   :  { %v598_v36 = vpop.f32.mrf.mxu1 }
 0x1dc   :  { %v601_v46 = vpop.f32.mrf.mxu1 }
 0x1e5   :  { %v604_v54 = vpop.f32.mrf.mxu1 }
 0x1f1   :  { %v475_v10 = vpop.f32.mrf.mxu2  ;;  %v504_v13 = vpop.f32.mrf.mxu3 }
 0x1f2   :  { %565 = vmatmul.f32.vlgmr.msra.gmra.mxu0 %v475_v10  ;;  %640 = vmatmul.f32.vlgmr.msrb.gmra.mxu2 %v504_v13 }
 0x1f9   :  { %v478_v15 = vpop.f32.mrf.mxu2  ;;  %v507_v16 = vpop.f32.mrf.mxu3 }
 0x1fa   :  { %568 = vmatmul.f32.gmra.mxu0 %v478_v15  ;;  %643 = vmatmul.f32.gmra.mxu2 %v507_v16 }
 0x201   :  { %v481_v19 = vpop.f32.mrf.mxu2  ;;  %v510_v20 = vpop.f32.mrf.mxu3 }
 0x202   :  { %571 = vmatmul.f32.gmra.mxu0 %v481_v19  ;;  %646 = vmatmul.f32.gmra.mxu2 %v510_v20 }
 0x209   :  { %v484_v0 = vpop.f32.mrf.mxu2  ;;  %v513_v21 = vpop.f32.mrf.mxu3 }
 0x20a   :  { %574 = vmatmul.f32.gmra.mxu0 %v484_v0  ;;  %649 = vmatmul.f32.gmra.mxu2 %v513_v21 }
 0x26f   :  { %v566_v27 = vpop.f32.mrf.mxu0 }
 0x270   :  { %v596_v29 = vadd.f32 %v595_v26, %v566_v27 }
 0x275   :  { %v641_v31 = vpop.f32.mrf.mxu2 }
 0x276   :  { %v653_v34 = vadd.f32 %v641_v31, %v596_v29 }
 0x277   :  { %v569_v37 = vpop.f32.mrf.mxu0 }
 0x278   :  { %v661_v38 = vmul.f32 %v764_v30, %v653_v34  ;;  %v599_v42 = vadd.f32 %v598_v36, %v569_v37 }
 0x27a   :  { %v669_v40 = vadd.f32 %v765_v35, %v661_v38 }
 0x27c   :  { %v673_v41 = vadd.f32 %v669_v40, %v454_v39 }
 0x27d   :  { %v644_v43 = vpop.f32.mrf.mxu2 }
 0x27e   :  { %v677_v45 = vmax.f32 %v673_v41, 0.0  ;;  %v654_v4 = vadd.f32 %v644_v43, %v599_v42 }
 0x27f   :  { %v572_v7 = vpop.f32.mrf.mxu0 }
 0x280   :  { %681 = vst [vmem:[#allocation13] sm:$0xff] %v677_v45  ;;  %v662_v11 = vmul.f32 %v764_v30, %v654_v4  ;;  %v602_v48 = vadd.f32 %v601_v46, %v572_v7 }
 0x282   :  { %v670_v14 = vadd.f32 %v765_v35, %v662_v11 }
 0x284   :  { %v674_v5 = vadd.f32 %v670_v14, %v455_v47 }
 0x285   :  { %v647_v17 = vpop.f32.mrf.mxu2 }
 0x286   :  { %v678_v12 = vmax.f32 %v674_v5, 0.0  ;;  %v655_v18 = vadd.f32 %v647_v17, %v602_v48 }
 0x287   :  { %v575_v51 = vpop.f32.mrf.mxu0 }
 0x288   :  { %682 = vst [vmem:[#allocation13 + $0x8] sm:$0xff] %v678_v12  ;;  %v663_v50 = vmul.f32 %v764_v30, %v655_v18  ;;  %v605_v56 = vadd.f32 %v604_v54, %v575_v51 }
 0x28a   :  { %v671_v53 = vadd.f32 %v765_v35, %v663_v50 }
 0x28c   :  { %v675_v55 = vadd.f32 %v671_v53, %v456_v52 }
 0x28d   :  { %v650_v57 = vpop.f32.mrf.mxu2 }
 0x28e   :  { %v679_v59 = vmax.f32 %v675_v55, 0.0  ;;  %v656_v60 = vadd.f32 %v650_v57, %v605_v56 }
 0x290   :  { %683 = vst [vmem:[#allocation13 + $0x10] sm:$0xff] %v679_v59  ;;  %v664_v61 = vmul.f32 %v764_v30, %v656_v60 }
 0x292   :  { %v672_v63 = vadd.f32 %v765_v35, %v664_v61 }
 0x294   :  { %v676_v2 = vadd.f32 %v672_v63, %v457_v62 }
 0x296   :  { %v680_v3 = vmax.f32 %v676_v2, 0.0 }
 0x298   :  { %684 = vst [vmem:[#allocation13 + $0x18] sm:$0xff] %v680_v3 }
 0x299   :  { %697 = dma.vmem_to_hbm [thread:$0]  %s690_s9, 512, %s692_s21, [#allocation4], %s945_s29, %s945_s29, %s946_s30  }
 0x29a   :  { %942 = dma.done.wait [#allocation4], 512  }
 0x29b   :  { %943 = vsyncadd [#allocation4], 4294966784 }
 0x29c   :  { %702 = vsyncpa [#allocation3], 1 }
 0x29d   :  { %703 = vsyncpa [#allocation6], 1 }
 0x29e   :  { %704 = vsyncpa [#allocation9], 1 }
 0x29f   :  { %705 = vsyncpa [#allocation12], 1 }
 0x2a0   :  { %706 = vsyncpa [#allocation4], 1 }

</bundles_post_ra>
